<compile_context>
chip_gen: v7x
topology: tpu7x:2x2x1
jax: 0.10.0
libtpu: 0.0.40
codegen_flags: <defaults>
</compile_context>

<pallas_src>
import functools

import numpy as np
import jax
import jax.numpy as jnp
from jax.experimental import pallas as pl
from jax.experimental.pallas import tpu as pltpu


def _round_up(n, m):
    return ((n + m - 1) // m) * m


def _spiking_ron_kernel(
    x_ref,      # (Bb, TT, Dp)  input block (dtype = matmul dtype)
    hy0_ref,    # (TT, Hp)      initial position rows for this time block (f32)
    hz0_ref,    # (TT, Hp)      initial velocity rows (f32)
    u0_ref,     # (TT, Hp)      initial membrane potential rows (f32)
    h2h_ref,    # (Hp, Hp)      hidden-to-hidden weights (matmul dtype)
    x2h_ref,    # (Dp, Hp)      input-to-hidden weights  (matmul dtype)
    gamma_ref,  # (1, Hp)
    eps_ref,    # (1, Hp)
    bias_ref,   # (1, Hp)       bias, zero in padded lanes
    hy_out,     # (Bb, TT, Hp)
    hz_out,     # (Bb, TT, Hp)
    u_out,      # (Bb, TT, Hp)
    spk_out,    # (TT, Hp)
    *,
    dt, threshold, reset, rc,
):
    f32 = jnp.float32
    Bb, TT, Dp = x_ref.shape
    Hp = h2h_ref.shape[0]

    hy0 = hy0_ref[...]          # (TT, Hp), f32
    hz0 = hz0_ref[...]
    u0 = u0_ref[...]

    # --- spiking layer: threshold mask computed once, reused for the spike
    #     output and the reset select. (Idempotent re-write across the
    #     "arbitrary" batch-block axis: identical values every revisit.) ---
    mask = u0 > threshold
    spk_out[...] = mask.astype(f32)
    u1 = jnp.where(mask, reset, u0)          # u[spike == 1] = reset

    # --- MXU matmuls (MXU is idle otherwise; K=Dp is tiny but cheap). ---
    hy_proj = jnp.dot(hy0.astype(h2h_ref.dtype), h2h_ref[...],
                      preferred_element_type=f32)               # (TT, Hp)
    # Collapse/expand only major dims (layout-preserving reshapes).
    x_proj = jnp.dot(x_ref[...].reshape(Bb * TT, Dp), x2h_ref[...],
                     preferred_element_type=f32).reshape(Bb, TT, Hp)

    rcdt = rc * dt
    # Hoisted (TT, Hp) affine terms — computed once per state row, not per
    # (batch, time) element.  Algebraically identical to the original:
    #   u  = u1 + (-u1 + hy@h2h + x@x2h + bias) * rc * dt
    #   hz = hz0 + dt*(u - gamma*hy0 - eps*hz0)
    #   hy = hy0 + dt*hz
    c_u = u1 * (1.0 - rcdt) + rcdt * (hy_proj + bias_ref[...])
    c_z = hz0 - dt * (gamma_ref[...] * hy0 + eps_ref[...] * hz0)

    # Big-tensor work: three FMAs on (Bb, TT, Hp).  Broadcast of the (TT, Hp)
    # state pairs the state row with the *time* index (original semantics,
    # requires B == T which the wrapper asserts).
    u_new = c_u[None] + rcdt * x_proj
    hz_new = c_z[None] + dt * u_new
    hy_new = hy0[None] + dt * hz_new

    # Lane-dense (Hp = k*128) full-vreg stores.
    u_out[...] = u_new
    hz_out[...] = hz_new
    hy_out[...] = hy_new


def _choose_blocks(B, T, Hp):
    """Pick (batch_block, time_block) so the double-buffered f32 output tiles
    stay ~6 MiB: comfortably inside the default scoped-VMEM limit on
    v5e (16 MiB), v6e (32 MiB) and v7x (32 MiB of 64 MiB physical)."""
    budget_rows = max(64, (6 * 1024 * 1024) // (3 * 4 * 2 * Hp))
    bb = min(B, max(1, budget_rows // 8))
    tt = budget_rows // bb
    if tt >= T:
        tt = T                          # full time extent in one block
    else:
        tt = max(8, (tt // 8) * 8)      # (8,128) rule when tiling the time axis
    return bb, tt


def spiking_ron_forward(x, hy0, hz0, u0, h2h, x2h, gamma, epsilon,
                        *, dt, threshold, reset, rc, bias,
                        matmul_dtype=jnp.float32):
    """Runs the (single) cell step of SpikingRON.forward as one Pallas call.

    `matmul_dtype=jnp.bfloat16` casts the weights and the matmul LHS to bf16
    (MXU-native on v6e/v7x, halves weight HBM/VMEM traffic) while keeping f32
    accumulation and f32 elementwise state math.
    """
    B, T, D = x.shape
    H = h2h.shape[0]
    # Required by the original PyTorch broadcast semantics (x.unsqueeze(1)).
    assert B == T, "SpikingRON.forward as written requires batch == time"

    f32 = jnp.float32
    # Lane-dense hidden axis (pad H to a multiple of 128) and a sublane-aligned
    # input dim (pad D to a multiple of 8).  Zero padding contributes exact
    # zeros through the matmuls; the wrapper strips it afterwards.
    Hp = _round_up(H, 128)
    Dp = _round_up(D, 8)
    pad_h = ((0, 0), (0, Hp - H))

    x_p = jnp.pad(x.astype(f32), ((0, 0), (0, 0), (0, Dp - D))).astype(matmul_dtype)
    hy0_p = jnp.pad(hy0.astype(f32), pad_h)
    hz0_p = jnp.pad(hz0.astype(f32), pad_h)
    u0_p = jnp.pad(u0.astype(f32), pad_h)
    h2h_p = jnp.pad(h2h.astype(f32), ((0, Hp - H), (0, Hp - H))).astype(matmul_dtype)
    x2h_p = jnp.pad(x2h.astype(f32), ((0, Dp - D), (0, Hp - H))).astype(matmul_dtype)
    gamma_p = jnp.pad(gamma.reshape(1, H).astype(f32), pad_h)
    eps_p = jnp.pad(epsilon.reshape(1, H).astype(f32), pad_h)
    # Bias as a lane vector, zero in padded lanes -> padded lanes of u/hz/hy
    # stay exactly zero (safe if the padded state is ever reused recurrently).
    bias_p = jnp.pad(jnp.full((1, H), bias, f32), pad_h)

    Bb, TT = _choose_blocks(B, T, Hp)
    grid = (pl.cdiv(T, TT), pl.cdiv(B, Bb))   # (time blocks, batch blocks)

    kernel = functools.partial(
        _spiking_ron_kernel,
        dt=float(dt), threshold=float(threshold),
        reset=float(reset), rc=float(rc),
    )

    const2 = lambda t, b: (0, 0)
    state_spec = pl.BlockSpec((TT, Hp), lambda t, b: (t, 0))
    big_out_spec = pl.BlockSpec((Bb, TT, Hp), lambda t, b: (b, t, 0))

    in_specs = [
        pl.BlockSpec((Bb, TT, Dp), lambda t, b: (b, t, 0)),   # x
        state_spec, state_spec, state_spec,                   # hy0, hz0, u0
        pl.BlockSpec((Hp, Hp), const2),                       # h2h (constant)
        pl.BlockSpec((Dp, Hp), const2),                       # x2h (constant)
        pl.BlockSpec((1, Hp), const2),                        # gamma
        pl.BlockSpec((1, Hp), const2),                        # epsilon
        pl.BlockSpec((1, Hp), const2),                        # bias
    ]
    out_specs = (
        big_out_spec,                                         # hy
        big_out_spec,                                         # hz
        big_out_spec,                                         # u
        pl.BlockSpec((TT, Hp), lambda t, b: (t, 0)),          # spike
    )
    out_shape = (
        jax.ShapeDtypeStruct((B, T, Hp), f32),   # hy
        jax.ShapeDtypeStruct((B, T, Hp), f32),   # hz
        jax.ShapeDtypeStruct((B, T, Hp), f32),   # u
        jax.ShapeDtypeStruct((B, Hp), f32),      # spike
    )

    # Advisory cost: the kernel is HBM-store-bound at real sizes (3 f32
    # (B,T,Hp) writebacks dominate bytes); flops are the two matmuls plus the
    # hoisted elementwise update.
    cost = pl.CostEstimate(
        flops=2 * B * T * Dp * Hp + 2 * T * Hp * Hp + 10 * B * T * Hp,
        transcendentals=0,
        bytes_accessed=4 * (3 * B * T * Hp + B * Hp        # outputs
                            + B * T * Dp + 3 * B * Hp      # x + states
                            + Hp * Hp + Dp * Hp + 3 * Hp), # weights/vectors
    )

    # Time axis "parallel" (all outputs are disjoint along it -> safe for the
    # v7x 2-TensorCore split); batch axis "arbitrary" (spk block is revisited
    # with identical values across it — standard resident-output pattern).
    # TODO(synk): mark the constant weight blocks pipeline_mode=pl.Buffered(1)
    # once single-buffered constants are required (they are tiny here).
    hy_p, hz_p, u_p, spk_p = pl.pallas_call(
        kernel,
        out_shape=out_shape,
        grid=grid,
        in_specs=in_specs,
        out_specs=out_specs,
        compiler_params=pltpu.CompilerParams(
            dimension_semantics=("parallel", "arbitrary")),
        cost_estimate=cost,
    )(x_p, hy0_p, hz0_p, u0_p, h2h_p, x2h_p, gamma_p, eps_p, bias_p)

    hy = hy_p[..., :H]
    hz = hz_p[..., :H]
    u = u_p[..., :H]
    spk = spk_p[:, :H]

    # The PyTorch forward's time loop runs exactly once -> length-1 lists.
    return [hy], [hz], [u], [spk]


def _reference_forward(x, hy, hz, u, h2h, x2h, gamma, epsilon,
                       *, dt, threshold, reset, rc, bias):
    """Pure-JAX mirror of the PyTorch code (for verification)."""
    spike = (u > threshold).astype(jnp.float32)
    u = jnp.where(spike == 1.0, reset, u)
    pre = hy @ h2h + jnp.einsum('btd,dh->bth', x, x2h) + bias   # (B,H)+(B,T,H)
    u_dot = -u + pre
    u = u + u_dot * rc * dt
    hz = hz + dt * (u - gamma * hy - epsilon * hz)
    hy = hy + dt * hz
    return hy, hz, u, spike


if __name__ == "__main__":
    # Hyperparameters (typical RON settings).
    n_inp, n_hid = 4, 32
    B = T = 8                     # B == T required by the original broadcast
    dt = 0.042
    gamma_c, gamma_range = 2.7, 2.7
    epsilon_c, epsilon_range = 4.7, 4.7
    rho = 0.99
    input_scaling = 1.0
    threshold = 1.0
    rc = 1.0
    reset = 0.0
    bias = 0.5

    key = jax.random.PRNGKey(0)
    k_x, k_g, k_e, k_h, k_w, k_s = jax.random.split(key, 6)

    # gamma / epsilon sampled uniformly in (c - range/2, c + range/2)
    gamma = (jax.random.uniform(k_g, (n_hid,), jnp.float32) * gamma_range
             + (gamma_c - gamma_range / 2.0))
    epsilon = (jax.random.uniform(k_e, (n_hid,), jnp.float32) * epsilon_range
               + (epsilon_c - epsilon_range / 2.0))

    # 'full' topology: uniform(-1, 1), rescaled so spectral radius == rho
    h2h = jax.random.uniform(k_h, (n_hid, n_hid), jnp.float32) * 2.0 - 1.0
    sr = float(np.max(np.abs(np.linalg.eigvals(np.asarray(h2h, np.float64)))))
    h2h = h2h * (rho / sr)

    # input-to-hidden weights in (0, input_scaling)
    x2h = jax.random.uniform(k_w, (n_inp, n_hid), jnp.float32) * input_scaling

    # Example input time-series.
    x = jax.random.normal(k_x, (B, T, n_inp), jnp.float32)

    hp = dict(dt=dt, threshold=threshold, reset=reset, rc=rc, bias=bias)

    def check(hy0, hz0, u0, *, matmul_dtype=jnp.float32, rtol=1e-5, atol=1e-4):
        hy_l, hz_l, u_l, spk_l = spiking_ron_forward(
            x, hy0, hz0, u0, h2h, x2h, gamma, epsilon,
            matmul_dtype=matmul_dtype, **hp)
        jax.block_until_ready((hy_l, hz_l, u_l, spk_l))
        hy_r, hz_r, u_r, spk_r = _reference_forward(
            x, hy0, hz0, u0, h2h, x2h, gamma, epsilon, **hp)
        np.testing.assert_allclose(np.asarray(hy_l[0]), np.asarray(hy_r),
                                   rtol=rtol, atol=atol)
        np.testing.assert_allclose(np.asarray(hz_l[0]), np.asarray(hz_r),
                                   rtol=rtol, atol=atol)
        np.testing.assert_allclose(np.asarray(u_l[0]), np.asarray(u_r),
                                   rtol=rtol, atol=atol)
        np.testing.assert_allclose(np.asarray(spk_l[0]), np.asarray(spk_r),
                                   rtol=0, atol=0)

    # 1) Exactly what SpikingRON.forward does: zero initial states.
    zeros = jnp.zeros((B, n_hid), jnp.float32)
    check(zeros, zeros, zeros)

    # 2) Non-trivial initial states so the spiking / reset branch is exercised.
    st = jax.random.normal(k_s, (3, B, n_hid), jnp.float32) * 1.5
    check(st[0], st[1], st[2])

    # 3) bf16 weight / matmul-LHS path (v6e/v7x MXU-native); elementwise state
    #    math stays f32, spikes stay bit-exact.
    check(st[0], st[1], st[2], matmul_dtype=jnp.bfloat16, rtol=5e-2, atol=5e-2)

    print("KERNEL_OK")
</pallas_src>

<mosaic_0001>
module attributes {stable_mosaic.version = 11 : i64} {
  func.func @_spiking_ron_kernel(%arg0: i32, %arg1: i32, %arg2: memref<8x8x8xf32, #tpu.memory_space<vmem>>, %arg3: memref<8x128xf32, #tpu.memory_space<vmem>>, %arg4: memref<8x128xf32, #tpu.memory_space<vmem>>, %arg5: memref<8x128xf32, #tpu.memory_space<vmem>>, %arg6: memref<128x128xf32, #tpu.memory_space<vmem>>, %arg7: memref<8x128xf32, #tpu.memory_space<vmem>>, %arg8: memref<1x128xf32, #tpu.memory_space<vmem>>, %arg9: memref<1x128xf32, #tpu.memory_space<vmem>>, %arg10: memref<1x128xf32, #tpu.memory_space<vmem>>, %arg11: memref<8x8x128xf32, #tpu.memory_space<vmem>>, %arg12: memref<8x8x128xf32, #tpu.memory_space<vmem>>, %arg13: memref<8x8x128xf32, #tpu.memory_space<vmem>>, %arg14: memref<8x128xf32, #tpu.memory_space<vmem>>) attributes {dimension_semantics = [#tpu.dimension_semantics<parallel>, #tpu.dimension_semantics<arbitrary>], iteration_bounds = array<i64: 1, 1>, scalar_prefetch = 0 : i64, scratch_operands = 0 : i64, tpu.core_type = #tpu.core_type<tc>, window_params = [{transform_indices = @transform_0, window_bounds = array<i64: 8, 8, 8>}, {transform_indices = @transform_1, window_bounds = array<i64: 8, 128>}, {transform_indices = @transform_2, window_bounds = array<i64: 8, 128>}, {transform_indices = @transform_3, window_bounds = array<i64: 8, 128>}, {pipeline_mode = #tpu.pipeline_mode<synchronous>, transform_indices = @transform_4, window_bounds = array<i64: 128, 128>}, {pipeline_mode = #tpu.pipeline_mode<synchronous>, transform_indices = @transform_5, window_bounds = array<i64: 8, 128>}, {pipeline_mode = #tpu.pipeline_mode<synchronous>, transform_indices = @transform_6, window_bounds = array<i64: 1, 128>}, {pipeline_mode = #tpu.pipeline_mode<synchronous>, transform_indices = @transform_7, window_bounds = array<i64: 1, 128>}, {pipeline_mode = #tpu.pipeline_mode<synchronous>, transform_indices = @transform_8, window_bounds = array<i64: 1, 128>}, {transform_indices = @transform_9, window_bounds = array<i64: 8, 8, 128>}, {transform_indices = @transform_10, window_bounds = array<i64: 8, 8, 128>}, {transform_indices = @transform_11, window_bounds = array<i64: 8, 8, 128>}, {transform_indices = @transform_12, window_bounds = array<i64: 8, 128>}]} {
    %c0 = arith.constant 0 : index
    %c0_0 = arith.constant 0 : index
    %0 = vector.load %arg3[%c0, %c0_0] : memref<8x128xf32, #tpu.memory_space<vmem>>, vector<8x128xf32>
    %c0_1 = arith.constant 0 : index
    %c0_2 = arith.constant 0 : index
    %1 = vector.load %arg4[%c0_1, %c0_2] : memref<8x128xf32, #tpu.memory_space<vmem>>, vector<8x128xf32>
    %c0_3 = arith.constant 0 : index
    %c0_4 = arith.constant 0 : index
    %2 = vector.load %arg5[%c0_3, %c0_4] : memref<8x128xf32, #tpu.memory_space<vmem>>, vector<8x128xf32>
    %cst = arith.constant 1.000000e+00 : f32
    %3 = vector.broadcast %cst : f32 to vector<8x128xf32>
    %4 = arith.cmpf ogt, %2, %3 : vector<8x128xf32>
    %5 = arith.extui %4 : vector<8x128xi1> to vector<8x128xi32>
    %6 = arith.sitofp %5 : vector<8x128xi32> to vector<8x128xf32>
    %c0_5 = arith.constant 0 : index
    %c0_6 = arith.constant 0 : index
    %7 = vector.load %arg14[%c0_5, %c0_6] : memref<8x128xf32, #tpu.memory_space<vmem>>, vector<8x128xf32>
    tpu.vector_store %arg14[%c0_5, %c0_6], %6 {strides = array<i32>} : memref<8x128xf32, #tpu.memory_space<vmem>>, vector<8x128xf32>,
    %cst_7 = arith.constant 0.000000e+00 : f32
    %8 = vector.broadcast %cst_7 : f32 to vector<8x128xf32>
    %9 = arith.select %4, %8, %2 : vector<8x128xi1>, vector<8x128xf32>
    %c0_8 = arith.constant 0 : index
    %c0_9 = arith.constant 0 : index
    %10 = vector.load %arg6[%c0_8, %c0_9] : memref<128x128xf32, #tpu.memory_space<vmem>>, vector<128x128xf32>
    %cst_10 = arith.constant dense<0.000000e+00> : vector<8x128xf32>
    %11 = tpu.matmul %0, %10, %cst_10 {dimension_numbers = #tpu.dot_dimension_numbers<[1], [0], [0], [1], [0, 0, 1, 1], [], []>} : vector<8x128xf32>, vector<128x128xf32>, vector<8x128xf32> -> vector<8x128xf32>
    %c0_11 = arith.constant 0 : index
    %c0_12 = arith.constant 0 : index
    %c0_13 = arith.constant 0 : index
    %12 = vector.load %arg2[%c0_11, %c0_12, %c0_13] : memref<8x8x8xf32, #tpu.memory_space<vmem>>, vector<8x8x8xf32>
    %13 = vector.shape_cast %12 : vector<8x8x8xf32> to vector<64x8xf32>
    %c0_14 = arith.constant 0 : index
    %c0_15 = arith.constant 0 : index
    %14 = vector.load %arg7[%c0_14, %c0_15] : memref<8x128xf32, #tpu.memory_space<vmem>>, vector<8x128xf32>
    %cst_16 = arith.constant dense<0.000000e+00> : vector<64x128xf32>
    %15 = tpu.matmul %13, %14, %cst_16 {dimension_numbers = #tpu.dot_dimension_numbers<[1], [0], [0], [1], [0, 0, 1, 1], [], []>} : vector<64x8xf32>, vector<8x128xf32>, vector<64x128xf32> -> vector<64x128xf32>
    %16 = vector.shape_cast %15 : vector<64x128xf32> to vector<8x8x128xf32>
    %cst_17 = arith.constant 9.580000e-01 : f32
    %17 = vector.broadcast %cst_17 : f32 to vector<8x128xf32>
    %18 = arith.mulf %9, %17 : vector<8x128xf32>
    %c0_18 = arith.constant 0 : index
    %c0_19 = arith.constant 0 : index
    %19 = vector.load %arg10[%c0_18, %c0_19] : memref<1x128xf32, #tpu.memory_space<vmem>>, vector<1x128xf32>
    %20 = vector.broadcast %19 : vector<1x128xf32> to vector<8x128xf32>
    %21 = arith.addf %11, %20 : vector<8x128xf32>
    %cst_20 = arith.constant 4.200000e-02 : f32
    %22 = vector.broadcast %cst_20 : f32 to vector<8x128xf32>
    %23 = arith.mulf %22, %21 : vector<8x128xf32>
    %24 = arith.addf %18, %23 : vector<8x128xf32>
    %c0_21 = arith.constant 0 : index
    %c0_22 = arith.constant 0 : index
    %25 = vector.load %arg8[%c0_21, %c0_22] : memref<1x128xf32, #tpu.memory_space<vmem>>, vector<1x128xf32>
    %26 = vector.broadcast %25 : vector<1x128xf32> to vector<8x128xf32>
    %27 = arith.mulf %26, %0 : vector<8x128xf32>
    %c0_23 = arith.constant 0 : index
    %c0_24 = arith.constant 0 : index
    %28 = vector.load %arg9[%c0_23, %c0_24] : memref<1x128xf32, #tpu.memory_space<vmem>>, vector<1x128xf32>
    %29 = vector.broadcast %28 : vector<1x128xf32> to vector<8x128xf32>
    %30 = arith.mulf %29, %1 : vector<8x128xf32>
    %31 = arith.addf %27, %30 : vector<8x128xf32>
    %cst_25 = arith.constant 4.200000e-02 : f32
    %32 = vector.broadcast %cst_25 : f32 to vector<8x128xf32>
    %33 = arith.mulf %32, %31 : vector<8x128xf32>
    %34 = arith.subf %1, %33 : vector<8x128xf32>
    %35 = vector.shape_cast %24 : vector<8x128xf32> to vector<1x8x128xf32>
    %cst_26 = arith.constant 4.200000e-02 : f32
    %36 = vector.broadcast %cst_26 : f32 to vector<8x8x128xf32>
    %37 = arith.mulf %36, %16 : vector<8x8x128xf32>
    %38 = vector.broadcast %35 : vector<1x8x128xf32> to vector<8x8x128xf32>
    %39 = arith.addf %38, %37 : vector<8x8x128xf32>
    %40 = vector.shape_cast %34 : vector<8x128xf32> to vector<1x8x128xf32>
    %cst_27 = arith.constant 4.200000e-02 : f32
    %41 = vector.broadcast %cst_27 : f32 to vector<8x8x128xf32>
    %42 = arith.mulf %41, %39 : vector<8x8x128xf32>
    %43 = vector.broadcast %40 : vector<1x8x128xf32> to vector<8x8x128xf32>
    %44 = arith.addf %43, %42 : vector<8x8x128xf32>
    %45 = vector.shape_cast %0 : vector<8x128xf32> to vector<1x8x128xf32>
    %cst_28 = arith.constant 4.200000e-02 : f32
    %46 = vector.broadcast %cst_28 : f32 to vector<8x8x128xf32>
    %47 = arith.mulf %46, %44 : vector<8x8x128xf32>
    %48 = vector.broadcast %45 : vector<1x8x128xf32> to vector<8x8x128xf32>
    %49 = arith.addf %48, %47 : vector<8x8x128xf32>
    %c0_29 = arith.constant 0 : index
    %c0_30 = arith.constant 0 : index
    %c0_31 = arith.constant 0 : index
    %50 = vector.load %arg13[%c0_29, %c0_30, %c0_31] : memref<8x8x128xf32, #tpu.memory_space<vmem>>, vector<8x8x128xf32>
    tpu.vector_store %arg13[%c0_29, %c0_30, %c0_31], %39 {strides = array<i32>} : memref<8x8x128xf32, #tpu.memory_space<vmem>>, vector<8x8x128xf32>,
    %c0_32 = arith.constant 0 : index
    %c0_33 = arith.constant 0 : index
    %c0_34 = arith.constant 0 : index
    %51 = vector.load %arg12[%c0_32, %c0_33, %c0_34] : memref<8x8x128xf32, #tpu.memory_space<vmem>>, vector<8x8x128xf32>
    tpu.vector_store %arg12[%c0_32, %c0_33, %c0_34], %44 {strides = array<i32>} : memref<8x8x128xf32, #tpu.memory_space<vmem>>, vector<8x8x128xf32>,
    %c0_35 = arith.constant 0 : index
    %c0_36 = arith.constant 0 : index
    %c0_37 = arith.constant 0 : index
    %52 = vector.load %arg11[%c0_35, %c0_36, %c0_37] : memref<8x8x128xf32, #tpu.memory_space<vmem>>, vector<8x8x128xf32>
    tpu.vector_store %arg11[%c0_35, %c0_36, %c0_37], %49 {strides = array<i32>} : memref<8x8x128xf32, #tpu.memory_space<vmem>>, vector<8x8x128xf32>,
    return
  }
  func.func @transform_0(%arg0: i32, %arg1: i32) -> (i32, i32, i32) {
    %c0_i32 = arith.constant 0 : i32
    %c0_i32_0 = arith.constant 0 : i32
    return %arg1, %arg0, %c0_i32 : i32, i32, i32
  }
  func.func @transform_1(%arg0: i32, %arg1: i32) -> (i32, i32) {
    %c0_i32 = arith.constant 0 : i32
    %c0_i32_0 = arith.constant 0 : i32
    return %arg0, %c0_i32 : i32, i32
  }
  func.func @transform_2(%arg0: i32, %arg1: i32) -> (i32, i32) {
    %c0_i32 = arith.constant 0 : i32
    %c0_i32_0 = arith.constant 0 : i32
    return %arg0, %c0_i32 : i32, i32
  }
  func.func @transform_3(%arg0: i32, %arg1: i32) -> (i32, i32) {
    %c0_i32 = arith.constant 0 : i32
    %c0_i32_0 = arith.constant 0 : i32
    return %arg0, %c0_i32 : i32, i32
  }
  func.func @transform_4(%arg0: i32, %arg1: i32) -> (i32, i32) {
    %c0_i32 = arith.constant 0 : i32
    %c0_i32_0 = arith.constant 0 : i32
    %c0_i32_1 = arith.constant 0 : i32
    return %c0_i32, %c0_i32_0 : i32, i32
  }
  func.func @transform_5(%arg0: i32, %arg1: i32) -> (i32, i32) {
    %c0_i32 = arith.constant 0 : i32
    %c0_i32_0 = arith.constant 0 : i32
    %c0_i32_1 = arith.constant 0 : i32
    return %c0_i32, %c0_i32_0 : i32, i32
  }
  func.func @transform_6(%arg0: i32, %arg1: i32) -> (i32, i32) {
    %c0_i32 = arith.constant 0 : i32
    %c0_i32_0 = arith.constant 0 : i32
    %c0_i32_1 = arith.constant 0 : i32
    return %c0_i32, %c0_i32_0 : i32, i32
  }
  func.func @transform_7(%arg0: i32, %arg1: i32) -> (i32, i32) {
    %c0_i32 = arith.constant 0 : i32
    %c0_i32_0 = arith.constant 0 : i32
    %c0_i32_1 = arith.constant 0 : i32
    return %c0_i32, %c0_i32_0 : i32, i32
  }
  func.func @transform_8(%arg0: i32, %arg1: i32) -> (i32, i32) {
    %c0_i32 = arith.constant 0 : i32
    %c0_i32_0 = arith.constant 0 : i32
    %c0_i32_1 = arith.constant 0 : i32
    return %c0_i32, %c0_i32_0 : i32, i32
  }
  func.func @transform_9(%arg0: i32, %arg1: i32) -> (i32, i32, i32) {
    %c0_i32 = arith.constant 0 : i32
    %c0_i32_0 = arith.constant 0 : i32
    return %arg1, %arg0, %c0_i32 : i32, i32, i32
  }
  func.func @transform_10(%arg0: i32, %arg1: i32) -> (i32, i32, i32) {
    %c0_i32 = arith.constant 0 : i32
    %c0_i32_0 = arith.constant 0 : i32
    return %arg1, %arg0, %c0_i32 : i32, i32, i32
  }
  func.func @transform_11(%arg0: i32, %arg1: i32) -> (i32, i32, i32) {
    %c0_i32 = arith.constant 0 : i32
    %c0_i32_0 = arith.constant 0 : i32
    return %arg1, %arg0, %c0_i32 : i32, i32, i32
  }
  func.func @transform_12(%arg0: i32, %arg1: i32) -> (i32, i32) {
    %c0_i32 = arith.constant 0 : i32
    %c0_i32_0 = arith.constant 0 : i32
    return %arg0, %c0_i32 : i32, i32
  }
}

</mosaic_0001>

<bundles_post_ra>
// kernel: tpu_custom_call.1
= control target key start
LH: loop header
LB: loop body
LE: loop exit
PB: predicated region body
PF: predicated region fallthrough
CT: control target
= control target key end

     0   :  { %18 = vsyncpa [#allocation3], 0  ;;  %s1069_s0 = inlined_call_operand.hbm [shape: f32[8,8,8], index: 0, kind: input, shape index: {}]   ;;  %s1070_s1 = inlined_call_operand.hbm [shape: f32[8,128], index: 1, kind: input, shape index: {}]   ;;  %s1071_s2 = inlined_call_operand.hbm [shape: f32[8,128], index: 2, kind: input, shape index: {}]   ;;  %s1072_s3 = inlined_call_operand.vmem [shape: f32[8,128], index: 3, kind: input, shape index: {}]   ;;  %s1073_s4 = inlined_call_operand.hbm [shape: f32[128,128], index: 4, kind: input, shape index: {}]   ;;  %s1074_s5 = inlined_call_operand.vmem [shape: f32[8,128], index: 5, kind: input, shape index: {}]   ;;  %s1075_s6 = inlined_call_operand.vmem [shape: f32[1,128], index: 6, kind: input, shape index: {}]   ;;  %s1076_s7 = inlined_call_operand.vmem [shape: f32[1,128], index: 7, kind: input, shape index: {}]   ;;  %s1077_s8 = inlined_call_operand.vmem [shape: f32[1,128], index: 8, kind: input, shape index: {}]   ;;  %s1078_s9 = inlined_call_operand.hbm [shape: f32[8,8,128], index: 9, kind: output, shape index: {0}]   ;;  %s1079_s10 = inlined_call_operand.hbm [shape: f32[8,8,128], index: 10, kind: output, shape index: {1}]   ;;  %s1080_s11 = inlined_call_operand.hbm [shape: f32[8,8,128], index: 11, kind: output, shape index: {2}]   ;;  %s1081_s12 = inlined_call_operand.hbm [shape: f32[8,128], index: 12, kind: output, shape index: {3}]  }
   0x1   :  { %19 = vsyncpa [#allocation6], 0 }
   0x2   :  { %20 = vsyncpa [#allocation9], 0 }
   0x3   :  { %21 = vsyncpa [#allocation4], 0 }
   0x4   :  { %22 = vsyncpa [#allocation12], 0 }
   0x5   :  { %23 = vsyncpa [#allocation15], 0  ;;  %s800_s21 = smov [#allocation5]   ;;  %s801_s23 = smov [#allocation2]  }
   0x6   :  { %s42_s22 = sshll.u32 %s800_s21, 4  ;;  %s29_s24 = sshll.u32 %s801_s23, 4  ;;  %s43_s22 = int_to_ptr.vmem [resolvable:$true] %s42_s22  ;;  %s878_s24 = int_to_ptr.vmem [resolvable:$true] %s29_s24 }
   0x7   :  { %s612_s27 = scalar_lea.hbm %s1070_s1, 128 }
   0x8   :  { %p613_p0 = scmp.ne.s32.totalorder %s1070_s1, %s612_s27  ;;  %p616_p1 = scmp.lt.u32.totalorder %s612_s27, %s1070_s1 }
   0xa   :  { %p618_p2 = pnand %p616_p1, %p613_p0 }
   0xc   :  { %621 = shalt.err (!%p618_p2)
}
   0xd   :  { %s622_s14 = scalar_lea.vmem %s43_s22, 128  ;;  %p627_p4 = scmp.lt.s32.totalorder %s43_s22, %s43_s22 }
   0xe   :  { %p623_p3 = scmp.ne.s32.totalorder %s43_s22, %s622_s14  ;;  %p628_p5 = scmp.lt.s32.totalorder %s622_s14, %s622_s14 }
  0x10   :  { %p629_p6 = por %p628_p5, %p627_p4 }
  0x12   :  { %p630_p7 = pnand %p629_p6, %p623_p3 }
  0x14   :  { %633 = shalt.err (!%p630_p7)
}
  0x15   :  { %45 = dma.hbm_to_vmem [thread:$0]  %s1070_s1, 128, %s43_s22, [#allocation6]  }
  0x16   :  { %s634_s19 = scalar_lea.hbm %s1069_s0, 1024 }
  0x17   :  { %p635_p8 = scmp.ne.s32.totalorder %s1069_s0, %s634_s19  ;;  %p638_p9 = scmp.lt.u32.totalorder %s634_s19, %s1069_s0 }
  0x19   :  { %p640_p10 = pnand %p638_p9, %p635_p8 }
  0x1b   :  { %643 = shalt.err (!%p640_p10)
}
  0x1c   :  { %s644_s26 = scalar_lea.vmem %s878_s24, 1024  ;;  %p649_p12 = scmp.lt.s32.totalorder %s878_s24, %s878_s24 }
  0x1d   :  { %p645_p11 = scmp.ne.s32.totalorder %s878_s24, %s644_s26  ;;  %p650_p13 = scmp.lt.s32.totalorder %s644_s26, %s644_s26 }
  0x1f   :  { %p651_p0 = por %p650_p13, %p649_p12 }
  0x21   :  { %p652_p1 = pnand %p651_p0, %p645_p11 }
  0x23   :  { %655 = shalt.err (!%p652_p1)
}
  0x24   :  { %s802_s1 = smov 128   ;;  %s803_s22 = smov 8  }
  0x25   :  { %35 = dma.hbm_to_vmem [thread:$0]  %s1069_s0, 1024, %s878_s24, [#allocation3], %s802_s1, %s802_s1, %s803_s22  }
  0x26   :  { %s804_s29 = smov [#allocation7]   ;;  %s805_s13 = smov [#allocation8]  }
  0x27   :  { %s52_s30 = sshll.u32 %s804_s29, 4  ;;  %s63_s14 = sshll.u32 %s805_s13, 4  ;;  %s53_s30 = int_to_ptr.vmem [resolvable:$true] %s52_s30  ;;  %s912_s14 = int_to_ptr.vmem [resolvable:$true] %s63_s14 }
  0x28   :  { %s656_s17 = scalar_lea.hbm %s1071_s2, 128 }
  0x29   :  { %p657_p2 = scmp.ne.s32.totalorder %s1071_s2, %s656_s17  ;;  %p660_p3 = scmp.lt.u32.totalorder %s656_s17, %s1071_s2 }
  0x2b   :  { %p662_p4 = pnand %p660_p3, %p657_p2 }
  0x2d   :  { %665 = shalt.err (!%p662_p4)
}
  0x2e   :  { %s666_s0 = scalar_lea.vmem %s53_s30, 128  ;;  %p671_p6 = scmp.lt.s32.totalorder %s53_s30, %s53_s30 }
  0x2f   :  { %p667_p5 = scmp.ne.s32.totalorder %s53_s30, %s666_s0  ;;  %p672_p7 = scmp.lt.s32.totalorder %s666_s0, %s666_s0 }
  0x31   :  { %p673_p8 = por %p672_p7, %p671_p6 }
  0x33   :  { %p674_p9 = pnand %p673_p8, %p667_p5 }
  0x35   :  { %677 = shalt.err (!%p674_p9)
}
  0x36   :  { %55 = dma.hbm_to_vmem [thread:$0]  %s1071_s2, 128, %s53_s30, [#allocation6]  }
  0x37   :  { %s678_s27 = scalar_lea.hbm %s1073_s4, 2048 }
  0x38   :  { %p679_p10 = scmp.ne.s32.totalorder %s1073_s4, %s678_s27  ;;  %p682_p11 = scmp.lt.u32.totalorder %s678_s27, %s1073_s4 }
  0x3a   :  { %p684_p12 = pnand %p682_p11, %p679_p10 }
  0x3c   :  { %687 = shalt.err (!%p684_p12)
}
  0x3d   :  { %s688_s16 = scalar_lea.vmem %s912_s14, 2048  ;;  %p693_p0 = scmp.lt.s32.totalorder %s912_s14, %s912_s14 }
  0x3e   :  { %p689_p13 = scmp.ne.s32.totalorder %s912_s14, %s688_s16  ;;  %p694_p1 = scmp.lt.s32.totalorder %s688_s16, %s688_s16 }
  0x40   :  { %p695_p2 = por %p694_p1, %p693_p0 }
  0x42   :  { %p696_p3 = pnand %p695_p2, %p689_p13 }
  0x44   :  { %699 = shalt.err (!%p696_p3)
}
  0x45   :  { %69 = dma.hbm_to_vmem [thread:$0]  %s1073_s4, 2048, %s912_s14, [#allocation9], %s802_s1, %s802_s1, %s803_s22  }
  0x46   :  { %788 = dma.done.wait [#allocation3], 1024  }
  0x47   :  { %789 = vsyncadd [#allocation3], 4294966272 }
  0x48   :  { %790 = dma.done.wait [#allocation6], 256  }
  0x49   :  { %791 = vsyncadd [#allocation6], 4294967040 }
  0x4a   :  { %792 = dma.done.wait [#allocation9], 2048  }
  0x4b   :  { %793 = vsyncadd [#allocation9], 4294965248  ;;  %v806_v0 = vmov 0.0|0.0   ;;  %vm807_vm0 = vmmov 0   ;;  %v808_v1 = vmov 0.0   ;;  %v98_v2 = vld [vmem:[#allocation8] sm:$0xff] }
  0x4c   :  { %575 = vmatprep.subr.bf16.mxu1 %v806_v0  ;;  %572 = vmatprep.mubr.msk.f32.mxu1 %vm807_vm0, %v808_v1  ;;  %v99_v3 = vld [vmem:[#allocation8 + $0x8] sm:$0xff]  ;;  %v100_v4 = vld [vmem:[#allocation8 + $0x10] sm:$0xff]  ;;  %v101_v6 = vld [vmem:[#allocation8 + $0x18] sm:$0xff]  ;;  %vm123_vm1 = vcmask 64512  }
  0x4d   :  { %v576_v5 = vpack.c.bf16 %v99_v3, %v98_v2  ;;  %v579_v7 = vpack.c.bf16 %v101_v6, %v100_v4  ;;  %v122_v8 = vld [vmem:[%s1074_s5] sm:$0xff]  ;;  %v102_v10 = vld [vmem:[#allocation8 + $0x20] sm:$0xff]  ;;  %v103_v11 = vld [vmem:[#allocation8 + $0x28] sm:$0xff] }
  0x4e   :  { %v114_v9 = vld [vmem:[#allocation2] sm:$0xff]  ;;  %526 = vmatprep.subr.mxu0 %v122_v8  ;;  %v115_v12 = vld [vmem:[#allocation2 + $0x8] sm:$0xff]  ;;  %v116_v13 = vld [vmem:[#allocation2 + $0x10] sm:$0xff]  ;;  %v582_v14 = vpack.c.bf16 %v103_v11, %v102_v10 }
  0x4f   :  { %577 = vmatpush3.bf16.msra.mxu1 %v576_v5  ;;  %527 = vmatpush3.msra.mxu0 %v122_v8  ;;  %v117_v15 = vld [vmem:[#allocation2 + $0x18] sm:$0xff]  ;;  %v92_v16 = vld [vmem:[%s1072_s3] sm:$0xff]  ;;  %v105_v18 = vld [vmem:[#allocation8 + $0x38] sm:$0xff]  ;;  %s809_s3 = smov [#allocation14]  }
  0x50   :  { %578 = vmatprep.subr.bf16.mxu1 %v806_v0  ;;  %528 = vmatprep.mubr.msk.f32.mxu0 %vm123_vm1, %v114_v9  ;;  %v104_v17 = vld [vmem:[#allocation8 + $0x30] sm:$0xff]  ;;  %vm93_vm2 = vcmp.gt.f32.partialorder %v92_v16, 1.0  ;;  %v119_v23 = vld [vmem:[#allocation2 + $0x28] sm:$0xff]  ;;  %v106_v24 = vld [vmem:[#allocation8 + $0x40] sm:$0xff]  ;;  %s466_s18 = sshll.u32 %s809_s3, 4  ;;  %s467_s18 = int_to_ptr.vmem [resolvable:$true] %s466_s18 }
  0x51   :  { %529 = vmatmul.mubr.msk.f32.vlgmr.msra.gmra.mrb[0].mxu0 %vm123_vm1, %v115_v12  ;;  %v118_v19 = vld [vmem:[#allocation2 + $0x20] sm:$0xff]  ;;  %v488_v20 = vsel %vm93_vm2, 1.0, %v808_v1  ;;  %v958_v21 = vsel %vm93_vm2, 0.0, %v92_v16  ;;  %v585_v22 = vpack.c.bf16 %v105_v18, %v104_v17  ;;  %v107_v25 = vld [vmem:[#allocation8 + $0x48] sm:$0xff]  ;;  %v120_v26 = vld [vmem:[#allocation2 + $0x30] sm:$0xff]  ;;  %s700_s19 = scalar_lea.vmem %s467_s18, 128  ;;  %p705_p5 = scmp.lt.s32.totalorder %s467_s18, %s467_s18 }
  0x52   :  { %531 = vmatprep.mubr.msk.f32.mxu0 %vm123_vm1, %v116_v13  ;;  %96 = vst [vmem:[#allocation14] sm:$0xff] %v488_v20  ;;  %v588_v27 = vpack.c.bf16 %v107_v25, %v106_v24  ;;  %v121_v28 = vld [vmem:[#allocation2 + $0x38] sm:$0xff]  ;;  %v108_v29 = vld [vmem:[#allocation8 + $0x50] sm:$0xff]  ;;  %v109_v30 = vld [vmem:[#allocation8 + $0x58] sm:$0xff]  ;;  %p701_p4 = scmp.ne.s32.totalorder %s467_s18, %s700_s19  ;;  %p706_p6 = scmp.lt.s32.totalorder %s700_s19, %s700_s19 }
  0x53   :  { %580 = vmatpush3.bf16.msra.mxu1 %v579_v7  ;;  %v591_v31 = vpack.c.bf16 %v109_v30, %v108_v29  ;;  %v110_v32 = vld [vmem:[#allocation8 + $0x60] sm:$0xff]  ;;  %v111_v33 = vld [vmem:[#allocation8 + $0x68] sm:$0xff]  ;;  %v112_v35 = vld [vmem:[#allocation8 + $0x70] sm:$0xff] }
  0x54   :  { %581 = vmatprep.subr.bf16.mxu1 %v806_v0  ;;  %v594_v34 = vpack.c.bf16 %v111_v33, %v110_v32  ;;  %v113_v36 = vld [vmem:[#allocation8 + $0x78] sm:$0xff]  ;;  %v970_v38 = vld [vmem:[#allocation5] sm:$0xff]  ;;  %p707_p7 = por %p706_p6, %p705_p5 }
  0x55   :  { %532 = vmatmul.mubr.msk.f32.gmra.mrb[2].mxu0 %vm123_vm1, %v117_v15  ;;  %v597_v37 = vpack.c.bf16 %v113_v36, %v112_v35 }
  0x56   :  { %534 = vmatprep.mubr.msk.f32.mxu0 %vm123_vm1, %v118_v19  ;;  %p708_p8 = pnand %p707_p7, %p701_p4 }
  0x57   :  { %583 = vmatpush3.bf16.msra.mxu1 %v582_v14 }
  0x58   :  { %584 = vmatprep.subr.bf16.mxu1 %v806_v0 }
  0x59   :  { %535 = vmatmul.mubr.msk.f32.gmra.mrb[4].mxu0 %vm123_vm1, %v119_v23 }
  0x5a   :  { %537 = vmatprep.mubr.msk.f32.mxu0 %vm123_vm1, %v120_v26 }
  0x5b   :  { %586 = vmatpush3.bf16.msra.mxu1 %v585_v22 }
  0x5c   :  { %587 = vmatprep.subr.bf16.mxu1 %v806_v0 }
  0x5d   :  { %538 = vmatmul.mubr.msk.f32.gmra.mrb[6].mxu0 %vm123_vm1, %v121_v28 }
  0x5f   :  { %589 = vmatpush3.bf16.msra.mxu1 %v588_v27 }
  0x60   :  { %590 = vmatprep.subr.bf16.mxu1 %v806_v0 }
  0x63   :  { %592 = vmatpush3.bf16.msra.mxu1 %v591_v31 }
  0x64   :  { %593 = vmatprep.subr.bf16.mxu1 %v806_v0 }
  0x67   :  { %595 = vmatpush3.bf16.msra.mxu1 %v594_v34 }
  0x68   :  { %596 = vmatprep.subr.bf16.mxu1 %v806_v0 }
  0x6b   :  { %598 = vmatpush3.bf16.msra.mxu1 %v597_v37 }
  0x6e   :  { %573 = vmatmul.mubr.f32.vlgmr.msra.gmra.mrb[0].mxu1 %v970_v38 }
  0x6f   :  { %711 = shalt.err (!%p708_p8)
}
  0x70   :  { %s712_s0 = scalar_lea.hbm %s1081_s12, 128 }
  0x71   :  { %p713_p9 = scmp.ne.s32.totalorder %s1081_s12, %s712_s0  ;;  %p716_p10 = scmp.lt.u32.totalorder %s712_s0, %s1081_s12 }
  0x73   :  { %p718_p11 = pnand %p716_p10, %p713_p9 }
  0x75   :  { %721 = shalt.err (!%p718_p11)
}
  0x76   :  { %469 = dma.vmem_to_hbm [thread:$0]  %s467_s18, 128, %s1081_s12, [#allocation15]   ;;  %v91_v47 = vld [vmem:[#allocation7] sm:$0xff]  ;;  %v498_v48 = vld [vmem:[%s1075_s6] ss:$0 sm:$0xff] }
  0x77   :  { %v499_v49 = vld [vmem:[%s1076_s7] ss:$0 sm:$0xff]  ;;  %v340_v50 = vmul.f32 %v498_v48, %v970_v38  ;;  %v253_v55 = vmul.f32 0.958, %v958_v21  ;;  %s810_s6 = smov [#allocation11]   ;;  %s812_s4 = smov [#allocation10]  }
  0x78   :  { %v348_v51 = vmul.f32 %v499_v49, %v91_v47  ;;  %v497_v52 = vld [vmem:[%s1077_s8] ss:$0 sm:$0xff]  ;;  %s996_s7 = sshll.u32 %s810_s6, 4  ;;  %s811_s8 = smov [#allocation13]   ;;  %s999_s7 = int_to_ptr.vmem [resolvable:$true] %s996_s7 }
  0x79   :  { %s453_s30 = sshll.u32 %s811_s8, 4  ;;  %s1005_s14 = sshll.u32 %s812_s4, 4  ;;  %s1001_s30 = int_to_ptr.vmem [resolvable:$true] %s453_s30  ;;  %s430_s14 = int_to_ptr.vmem [resolvable:$true] %s1005_s14 }
  0x7a   :  { %v349_v53 = vadd.f32 %v348_v51, %v340_v50  ;;  %s722_s17 = scalar_lea.vmem %s999_s7, 1024  ;;  %p727_p13 = scmp.lt.s32.totalorder %s999_s7, %s999_s7 }
  0x7b   :  { %p723_p12 = scmp.ne.s32.totalorder %s999_s7, %s722_s17  ;;  %p728_p0 = scmp.lt.s32.totalorder %s722_s17, %s722_s17 }
  0x7c   :  { %v350_v58 = vmul.f32 0.042, %v349_v53 }
  0x7d   :  { %p729_p1 = por %p728_p0, %p727_p13 }
  0x7e   :  { %v351_v5 = vsub.f32 %v91_v47, %v350_v58 }
  0x7f   :  { %p730_p2 = pnand %p729_p1, %p723_p12 }
 0x124   :  { %v530_v39 = vpop.f32.mrb[0].mxu0 }
 0x125   :  { %v214_v40 = vpop.f32.mrb[1].mxu0  ;;  %v353_v62 = vmul.f32 0.042, %v530_v39 }
 0x126   :  { %v352_v63 = vmul.f32 0.042, %v214_v40 }
 0x128   :  { %v533_v41 = vpop.f32.mrb[2].mxu0 }
 0x129   :  { %v224_v42 = vpop.f32.mrb[3].mxu0  ;;  %v355_v0 = vmul.f32 0.042, %v533_v41 }
 0x12a   :  { %v354_v2 = vmul.f32 0.042, %v224_v42 }
 0x12c   :  { %v536_v43 = vpop.f32.mrb[4].mxu0 }
 0x12d   :  { %v234_v44 = vpop.f32.mrb[5].mxu0  ;;  %v357_v3 = vmul.f32 0.042, %v536_v43 }
 0x12e   :  { %v356_v4 = vmul.f32 0.042, %v234_v44 }
 0x130   :  { %v539_v45 = vpop.f32.mrb[6].mxu0 }
 0x131   :  { %v244_v46 = vpop.f32.mrb[7].mxu0  ;;  %v359_v60 = vmul.f32 0.042, %v539_v45 }
 0x132   :  { %v358_v61 = vmul.f32 0.042, %v244_v46 }
 0x141   :  { %v327_v54 = vpop.f32.mrb[0].mxu1 }
 0x142   :  { %v328_v56 = vadd.f32 %v497_v52, %v327_v54  ;;  %v574_v57 = vpop.f32.mrb[1].mxu1 }
 0x144   :  { %v331_v59 = vmul.f32 0.042, %v328_v56 }
 0x146   :  { %v332_v1 = vadd.f32 %v331_v59, %v253_v55 }
 0x148   :  { %v367_v6 = vadd.f32 %v359_v60, %v332_v1  ;;  %v366_v7 = vadd.f32 %v358_v61, %v332_v1  ;;  %v360_v8 = vadd.f32 %v352_v63, %v332_v1  ;;  %v361_v9 = vadd.f32 %v353_v62, %v332_v1 }
 0x149   :  { %v362_v10 = vadd.f32 %v354_v2, %v332_v1  ;;  %v363_v11 = vadd.f32 %v355_v0, %v332_v1  ;;  %v364_v12 = vadd.f32 %v356_v4, %v332_v1  ;;  %v365_v13 = vadd.f32 %v357_v3, %v332_v1 }
 0x14a   :  { %v375_v14 = vmul.f32 0.042, %v367_v6  ;;  %407 = vst [vmem:[#allocation13 + $0x38] sm:$0xff] %v367_v6  ;;  %v374_v15 = vmul.f32 0.042, %v366_v7  ;;  %406 = vst [vmem:[#allocation13 + $0x30] sm:$0xff] %v366_v7 }
 0x14b   :  { %v368_v16 = vmul.f32 0.042, %v360_v8  ;;  %400 = vst [vmem:[#allocation13] sm:$0xff] %v360_v8  ;;  %401 = vst [vmem:[#allocation13 + $0x8] sm:$0xff] %v361_v9  ;;  %v369_v17 = vmul.f32 0.042, %v361_v9 }
 0x14c   :  { %v370_v18 = vmul.f32 0.042, %v362_v10  ;;  %v371_v19 = vmul.f32 0.042, %v363_v11  ;;  %402 = vst [vmem:[#allocation13 + $0x10] sm:$0xff] %v362_v10  ;;  %403 = vst [vmem:[#allocation13 + $0x18] sm:$0xff] %v363_v11  ;;  %v383_v20 = vadd.f32 %v375_v14, %v351_v5  ;;  %v382_v21 = vadd.f32 %v374_v15, %v351_v5 }
 0x14d   :  { %404 = vst [vmem:[#allocation13 + $0x20] sm:$0xff] %v364_v12  ;;  %405 = vst [vmem:[#allocation13 + $0x28] sm:$0xff] %v365_v13  ;;  %v372_v22 = vmul.f32 0.042, %v364_v12  ;;  %v373_v23 = vmul.f32 0.042, %v365_v13  ;;  %v376_v24 = vadd.f32 %v368_v16, %v351_v5  ;;  %v377_v25 = vadd.f32 %v369_v17, %v351_v5 }
 0x14e   :  { %v378_v26 = vadd.f32 %v370_v18, %v351_v5  ;;  %v379_v27 = vadd.f32 %v371_v19, %v351_v5  ;;  %v391_v28 = vmul.f32 0.042, %v383_v20  ;;  %415 = vst [vmem:[#allocation11 + $0x38] sm:$0xff] %v383_v20  ;;  %v390_v29 = vmul.f32 0.042, %v382_v21  ;;  %414 = vst [vmem:[#allocation11 + $0x30] sm:$0xff] %v382_v21 }
 0x14f   :  { %v380_v30 = vadd.f32 %v372_v22, %v351_v5  ;;  %v381_v31 = vadd.f32 %v373_v23, %v351_v5  ;;  %408 = vst [vmem:[#allocation11] sm:$0xff] %v376_v24  ;;  %409 = vst [vmem:[#allocation11 + $0x8] sm:$0xff] %v377_v25  ;;  %v384_v32 = vmul.f32 0.042, %v376_v24  ;;  %v385_v33 = vmul.f32 0.042, %v377_v25 }
 0x150   :  { %410 = vst [vmem:[#allocation11 + $0x10] sm:$0xff] %v378_v26  ;;  %411 = vst [vmem:[#allocation11 + $0x18] sm:$0xff] %v379_v27  ;;  %v386_v34 = vmul.f32 0.042, %v378_v26  ;;  %v399_v35 = vadd.f32 %v391_v28, %v970_v38  ;;  %v398_v36 = vadd.f32 %v390_v29, %v970_v38  ;;  %v387_v37 = vmul.f32 0.042, %v379_v27 }
 0x151   :  { %412 = vst [vmem:[#allocation11 + $0x20] sm:$0xff] %v380_v30  ;;  %413 = vst [vmem:[#allocation11 + $0x28] sm:$0xff] %v381_v31  ;;  %v388_v39 = vmul.f32 0.042, %v380_v30 }
 0x152   :  { %733 = shalt.err (!%p730_p2)
}
 0x153   :  { %s734_s18 = scalar_lea.hbm %s1079_s10, 1024 }
 0x154   :  { %p735_p3 = scmp.ne.s32.totalorder %s1079_s10, %s734_s18  ;;  %p738_p4 = scmp.lt.u32.totalorder %s734_s18, %s1079_s10 }
 0x156   :  { %p740_p5 = pnand %p738_p4, %p735_p3 }
 0x158   :  { %743 = shalt.err (!%p740_p5)
}
 0x159   :  { %447 = dma.vmem_to_hbm [thread:$0]  %s999_s7, 1024, %s1079_s10, [#allocation12], %s802_s1, %s802_s1, %s803_s22   ;;  %v389_v40 = vmul.f32 0.042, %v381_v31  ;;  %v392_v41 = vadd.f32 %v384_v32, %v970_v38  ;;  %v393_v42 = vadd.f32 %v385_v33, %v970_v38  ;;  %v394_v43 = vadd.f32 %v386_v34, %v970_v38  ;;  %423 = vst [vmem:[#allocation10 + $0x38] sm:$0xff] %v399_v35  ;;  %422 = vst [vmem:[#allocation10 + $0x30] sm:$0xff] %v398_v36 }
 0x15a   :  { %v395_v44 = vadd.f32 %v387_v37, %v970_v38  ;;  %v396_v45 = vadd.f32 %v388_v39, %v970_v38  ;;  %s744_s25 = scalar_lea.vmem %s1001_s30, 1024  ;;  %p749_p7 = scmp.lt.s32.totalorder %s1001_s30, %s1001_s30 }
 0x15b   :  { %p745_p6 = scmp.ne.s32.totalorder %s1001_s30, %s744_s25  ;;  %p750_p8 = scmp.lt.s32.totalorder %s744_s25, %s744_s25 }
 0x15d   :  { %p751_p9 = por %p750_p8, %p749_p7 }
 0x15f   :  { %p752_p10 = pnand %p751_p9, %p745_p6 }
 0x161   :  { %755 = shalt.err (!%p752_p10)
}
 0x162   :  { %s756_s27 = scalar_lea.hbm %s1080_s11, 1024 }
 0x163   :  { %p757_p11 = scmp.ne.s32.totalorder %s1080_s11, %s756_s27  ;;  %p760_p12 = scmp.lt.u32.totalorder %s756_s27, %s1080_s11 }
 0x165   :  { %p762_p13 = pnand %p760_p12, %p757_p11 }
 0x167   :  { %765 = shalt.err (!%p762_p13)
}
 0x168   :  { %459 = dma.vmem_to_hbm [thread:$0]  %s1001_s30, 1024, %s1080_s11, [#allocation12], %s802_s1, %s802_s1, %s803_s22   ;;  %v397_v46 = vadd.f32 %v389_v40, %v970_v38  ;;  %416 = vst [vmem:[#allocation10] sm:$0xff] %v392_v41  ;;  %417 = vst [vmem:[#allocation10 + $0x8] sm:$0xff] %v393_v42 }
 0x169   :  { %418 = vst [vmem:[#allocation10 + $0x10] sm:$0xff] %v394_v43  ;;  %419 = vst [vmem:[#allocation10 + $0x18] sm:$0xff] %v395_v44  ;;  %s766_s2 = scalar_lea.vmem %s430_s14, 1024  ;;  %p771_p1 = scmp.lt.s32.totalorder %s430_s14, %s430_s14 }
 0x16a   :  { %420 = vst [vmem:[#allocation10 + $0x20] sm:$0xff] %v396_v45  ;;  %421 = vst [vmem:[#allocation10 + $0x28] sm:$0xff] %v397_v46  ;;  %p767_p0 = scmp.ne.s32.totalorder %s430_s14, %s766_s2  ;;  %p772_p2 = scmp.lt.s32.totalorder %s766_s2, %s766_s2 }
 0x16c   :  { %p773_p3 = por %p772_p2, %p771_p1 }
 0x16e   :  { %p774_p4 = pnand %p773_p3, %p767_p0 }
 0x170   :  { %777 = shalt.err (!%p774_p4)
}
 0x171   :  { %s778_s11 = scalar_lea.hbm %s1078_s9, 1024 }
 0x172   :  { %p779_p5 = scmp.ne.s32.totalorder %s1078_s9, %s778_s11  ;;  %p782_p6 = scmp.lt.u32.totalorder %s778_s11, %s1078_s9 }
 0x174   :  { %p784_p7 = pnand %p782_p6, %p779_p5 }
 0x176   :  { %787 = shalt.err (!%p784_p7)
}
 0x177   :  { %435 = dma.vmem_to_hbm [thread:$0]  %s430_s14, 1024, %s1078_s9, [#allocation4], %s802_s1, %s802_s1, %s803_s22  }
 0x178   :  { %794 = dma.done.wait [#allocation4], 1024  }
 0x179   :  { %795 = vsyncadd [#allocation4], 4294966272 }
 0x17a   :  { %796 = dma.done.wait [#allocation12], 2048  }
 0x17b   :  { %797 = vsyncadd [#allocation12], 4294965248 }
 0x17c   :  { %798 = dma.done.wait [#allocation15], 128  }
 0x17d   :  { %799 = vsyncadd [#allocation15], 4294967168 }
 0x17e   :  { %482 = vsyncpa [#allocation3], 1 }
 0x17f   :  { %483 = vsyncpa [#allocation6], 1 }
 0x180   :  { %484 = vsyncpa [#allocation9], 1 }
 0x181   :  { %485 = vsyncpa [#allocation4], 1 }
 0x182   :  { %486 = vsyncpa [#allocation12], 1 }
 0x183   :  { %487 = vsyncpa [#allocation15], 1 }

</bundles_post_ra>
